<compile_context>
chip_gen: v7x
topology: tpu7x:2x2x1
jax: 0.10.0
libtpu: 0.0.40
codegen_flags: <defaults>
</compile_context>

<pallas_src>
import numpy as np
import jax
import jax.numpy as jnp
from jax.experimental import pallas as pl
from jax.experimental.pallas import tpu as pltpu

EPS = 1e-5                       # BatchNorm1d default eps
VMEM_LIMIT = 48 * 1024 * 1024    # explicit scoped-VMEM budget: raises v5e's 16 MiB
                                 # default, stays inside v7x's 64 MiB physical VMEM


def _conv_rows_f32(x_ref, w_ref, xpad_scr, b, L):
    """Conv1d(k=3, stride=1, padding=1, padding_mode='replicate') for batch row b.

    The replicate halo is built in a (L+2, Cin) f32 VMEM scratch (no padded copy
    ever touches HBM), then the conv is three accumulating, lane-aligned tap
    matmuls into one (L, Cout) f32 value (no (L, 3*Cout) intermediate and no
    non-128-aligned lane slices).
    """
    xb = x_ref[b].astype(jnp.float32)                  # (L, Cin) bf16 -> f32
    xpad_scr[1:L + 1, :] = xb                          # bulk
    xpad_scr[0:1, :] = xb[0:1, :]                      # left  replicate halo
    xpad_scr[L + 1:L + 2, :] = xb[L - 1:L, :]          # right replicate halo
    y = jnp.dot(xpad_scr[0:L, :], w_ref[0],
                preferred_element_type=jnp.float32)
    y = y + jnp.dot(xpad_scr[1:L + 1, :], w_ref[1],
                    preferred_element_type=jnp.float32)
    y = y + jnp.dot(xpad_scr[2:L + 2, :], w_ref[2],
                    preferred_element_type=jnp.float32)
    return y                                           # (L, Cout) f32


def stats_kernel(x_ref, w_ref, stats_ref, xpad_scr):
    """Pass 1: per-channel sum / sum-of-squares of the conv output (BN batch stats)."""
    Bblk, L, _ = x_ref.shape
    Cout = stats_ref.shape[1]

    @pl.when(pl.program_id(1) == 0)
    def _init():
        stats_ref[...] = jnp.zeros_like(stats_ref)

    s = jnp.zeros((1, Cout), jnp.float32)
    ss = jnp.zeros((1, Cout), jnp.float32)
    for b in range(Bblk):                              # static, small unroll
        y = _conv_rows_f32(x_ref, w_ref, xpad_scr, b, L)
        s = s + jnp.sum(y, axis=0, keepdims=True)
        ss = ss + jnp.sum(y * y, axis=0, keepdims=True)
    # TODO(synk): E[y^2]-E[y]^2 in f32 can cancel catastrophically for very large
    # B*L or large-mean conv outputs; switch to shifted/Welford accumulation there.
    stats_ref[0:1, :] += s
    stats_ref[1:2, :] += ss


def apply_kernel(x_ref, w_ref, scale_ref, shift_ref, out_ref, xpad_scr, h_scr):
    """Pass 2: conv (recompute) + folded BN FMA + ReLU + MaxPool1d(3, 2, 1)."""
    Bblk, L, _ = x_ref.shape
    L_out, Cout = out_ref.shape[1], out_ref.shape[2]
    scale = scale_ref[...]                             # (1, Cout) f32
    shift = shift_ref[...]

    # Pool pad rows.  Zero padding is equivalent to PyTorch's -inf pad ONLY
    # because h >= 0 after ReLU; if conv_activation ever changes to something
    # that can go negative, these must become -inf.
    h_scr[0:1, :] = jnp.zeros((1, Cout), jnp.float32)
    if L % 2 == 1:                                     # static branch: right pad row
        h_scr[L + 1:L + 2, :] = jnp.zeros((1, Cout), jnp.float32)

    for b in range(Bblk):                              # static, small unroll
        y = _conv_rows_f32(x_ref, w_ref, xpad_scr, b, L)      # (L, Cout) f32
        h = jnp.maximum(y * scale + shift, 0.0)               # BN FMA + ReLU
        h_scr[1:L + 1, :] = h
        # Pooled index j covers input rows {2j-1, 2j, 2j+1} -> scratch rows
        # {2j, 2j+1, 2j+2}: three strided sublane reads + elementwise max (VPU).
        left = h_scr[pl.ds(0, L_out, stride=2), :]
        center = h_scr[pl.ds(1, L_out, stride=2), :]
        right = h_scr[pl.ds(2, L_out, stride=2), :]
        out_ref[b] = jnp.maximum(jnp.maximum(center, right), left)


def _pick_bblk(B, L, Cin, Cout, L_out):
    """Largest divisor of B (<=16) whose per-grid-step footprint stays small.

    More rows per step amortises the ~0.35 us per-step overhead and enlarges the
    DMA transfers while keeping the double-buffered blocks + scratch well inside
    every generation's VMEM (v5e/v6e 128 MiB, v7x 64 MiB)."""
    best = 1
    for cand in range(1, min(B, 16) + 1):
        if B % cand:
            continue
        step_bytes = (
            2 * cand * L * Cin * 2              # double-buffered x block (bf16)
            + 2 * cand * L_out * Cout * 4       # double-buffered out block (f32)
            + (L + 2) * Cin * 4                 # pad scratch (f32)
            + (2 * L_out + 1) * Cout * 4        # pool scratch (f32)
            + 4 * L * Cout * 4                  # conv/activation intermediates
            + 3 * Cin * Cout * 4)               # weights
        if step_bytes <= (8 << 20):
            best = cand
    return best


@jax.jit
def conv_layer_forward(x, w, gamma, beta):
    """x: (B, L, C_in) float32, w: (3, C_in, C_out) tap-major -> (B, L_out, C_out)."""
    B, L, Cin = x.shape
    Cout = w.shape[-1]
    L_out = (L - 1) // 2 + 1                   # MaxPool1d(k=3, s=2, p=1)

    # x read from HBM as bf16 (halves the dominant read traffic; it is read by
    # both passes).  Weights are tiny -> keep f32.  All accumulation is f32.
    x_bf = x.astype(jnp.bfloat16)

    Bblk = _pick_bblk(B, L, Cin, Cout, L_out)
    nb = B // Bblk                              # number of batch blocks
    nsplit = 2 if nb % 2 == 0 else 1            # v7x: one split per TensorCore
    steps = nb // nsplit

    # ---- Pass 1: BatchNorm batch statistics (resident accumulator per split) ----
    partial = pl.pallas_call(
        stats_kernel,
        out_shape=jax.ShapeDtypeStruct((nsplit, 2, Cout), jnp.float32),
        grid=(nsplit, steps),
        in_specs=[pl.BlockSpec((Bblk, L, Cin), lambda s, i: (s * steps + i, 0, 0)),
                  pl.BlockSpec((3, Cin, Cout), lambda s, i: (0, 0, 0))],
        out_specs=pl.BlockSpec((None, 2, Cout), lambda s, i: (s, 0, 0)),
        scratch_shapes=[pltpu.VMEM((L + 2, Cin), jnp.float32)],
        compiler_params=pltpu.CompilerParams(
            dimension_semantics=("parallel", "arbitrary"),
            vmem_limit_bytes=VMEM_LIMIT),
    )(x_bf, w)
    stats = jnp.sum(partial, axis=0)            # (2, Cout)

    n = float(B * L)
    mean = stats[0] / n
    var = stats[1] / n - mean * mean            # biased variance (training-mode BN)
    scale = gamma * jax.lax.rsqrt(var + EPS)    # fold gamma * rsqrt(var + eps)
    shift = beta - mean * scale                 # fold beta - mean * scale

    # ---- Pass 2: conv + BN-FMA + ReLU + MaxPool, parallel over batch blocks ----
    # TODO(synk): for small C_out the output store is a masked (<128-lane) vst;
    # padding C_out up to 128 in the kernel output and slicing in the wrapper is
    # only worth it once C_out is large enough that extra write bytes don't dominate.
    out = pl.pallas_call(
        apply_kernel,
        out_shape=jax.ShapeDtypeStruct((B, L_out, Cout), jnp.float32),
        grid=(nb,),
        in_specs=[pl.BlockSpec((Bblk, L, Cin), lambda i: (i, 0, 0)),
                  pl.BlockSpec((3, Cin, Cout), lambda i: (0, 0, 0)),
                  pl.BlockSpec((1, Cout), lambda i: (0, 0)),
                  pl.BlockSpec((1, Cout), lambda i: (0, 0))],
        out_specs=pl.BlockSpec((Bblk, L_out, Cout), lambda i: (i, 0, 0)),
        scratch_shapes=[pltpu.VMEM((L + 2, Cin), jnp.float32),
                        pltpu.VMEM((2 * L_out + 1, Cout), jnp.float32)],
        compiler_params=pltpu.CompilerParams(
            dimension_semantics=("parallel",),
            vmem_limit_bytes=VMEM_LIMIT),
    )(x_bf, w, scale.reshape(1, Cout), shift.reshape(1, Cout))
    return out


def reference_forward(x, w, gamma, beta):
    """Pure-JAX reference mirroring the PyTorch module (same bf16 rounding of x
    as the kernel boundary; all math in f32)."""
    x = x.astype(jnp.bfloat16).astype(jnp.float32)
    B, L, Cin = x.shape
    L_out = (L - 1) // 2 + 1
    xp = jnp.pad(x, ((0, 0), (1, 1), (0, 0)), mode="edge")
    y = sum(jnp.einsum("blc,cd->bld", xp[:, k:k + L, :], w[k]) for k in range(3))
    mean = y.mean(axis=(0, 1))
    var = y.var(axis=(0, 1))                                     # biased, as BN uses
    h = (y - mean) / jnp.sqrt(var + EPS) * gamma + beta
    h = jnp.maximum(h, 0.0)
    hp = jnp.pad(h, ((0, 0), (1, 1), (0, 0)), constant_values=-jnp.inf)
    out = jnp.stack([hp[:, 2 * j:2 * j + 3, :].max(axis=1) for j in range(L_out)],
                    axis=1)
    return out


if __name__ == "__main__":
    B, L, C_in, C_out = 2, 16, 4, 8

    key = jax.random.PRNGKey(0)
    kx, kw = jax.random.split(key)
    x = jax.random.normal(kx, (B, L, C_in), jnp.float32)
    # Deterministic synthetic parameters (shapes from the module __init__):
    w = jax.random.normal(kw, (3, C_in, C_out), jnp.float32) * 0.1  # Conv1d weight (tap-major)
    gamma = jnp.ones((C_out,), jnp.float32)                         # BatchNorm1d.weight init
    beta = jnp.zeros((C_out,), jnp.float32)                         # BatchNorm1d.bias init
    # TODO(synk): BatchNorm running-stat updates are stateful training bookkeeping and
    # do not affect this forward output; they are not modeled here.

    out = jax.block_until_ready(conv_layer_forward(x, w, gamma, beta))
    ref = reference_forward(x, w, gamma, beta)

    assert out.shape == (B, (L - 1) // 2 + 1, C_out), out.shape
    np.testing.assert_allclose(np.asarray(out), np.asarray(ref), rtol=2e-3, atol=2e-3)
    print("KERNEL_OK")
</pallas_src>

<mosaic_0001>
module attributes {stable_mosaic.version = 11 : i64} {
  func.func @apply_kernel(%arg0: i32, %arg1: memref<2x16x4xbf16, #tpu.memory_space<vmem>>, %arg2: memref<3x4x8xf32, #tpu.memory_space<vmem>>, %arg3: memref<1x8xf32, #tpu.memory_space<vmem>>, %arg4: memref<1x8xf32, #tpu.memory_space<vmem>>, %arg5: memref<2x8x8xf32, #tpu.memory_space<vmem>>, %arg6: memref<18x4xf32, #tpu.memory_space<vmem>>, %arg7: memref<17x8xf32, #tpu.memory_space<vmem>>) attributes {dimension_semantics = [#tpu.dimension_semantics<parallel>], iteration_bounds = array<i64: 1>, scalar_prefetch = 0 : i64, scratch_operands = 2 : i64, tpu.core_type = #tpu.core_type<tc>, window_params = [{transform_indices = @transform_0, window_bounds = array<i64: 2, 16, 4>}, {pipeline_mode = #tpu.pipeline_mode<synchronous>, transform_indices = @transform_1, window_bounds = array<i64: 3, 4, 8>}, {pipeline_mode = #tpu.pipeline_mode<synchronous>, transform_indices = @transform_2, window_bounds = array<i64: 1, 8>}, {pipeline_mode = #tpu.pipeline_mode<synchronous>, transform_indices = @transform_3, window_bounds = array<i64: 1, 8>}, {transform_indices = @transform_4, window_bounds = array<i64: 2, 8, 8>}]} {
    %c0 = arith.constant 0 : index
    %c0_0 = arith.constant 0 : index
    %0 = vector.load %arg3[%c0, %c0_0] : memref<1x8xf32, #tpu.memory_space<vmem>>, vector<1x8xf32>
    %c0_1 = arith.constant 0 : index
    %c0_2 = arith.constant 0 : index
    %1 = vector.load %arg4[%c0_1, %c0_2] : memref<1x8xf32, #tpu.memory_space<vmem>>, vector<1x8xf32>
    %cst = arith.constant 0.000000e+00 : f32
    %2 = vector.broadcast %cst : f32 to vector<1x8xf32>
    %c0_3 = arith.constant 0 : index
    %c0_4 = arith.constant 0 : index
    %3 = vector.load %arg7[%c0_3, %c0_4] : memref<17x8xf32, #tpu.memory_space<vmem>>, vector<1x8xf32>
    tpu.vector_store %arg7[%c0_3, %c0_4], %2 {strides = array<i32>} : memref<17x8xf32, #tpu.memory_space<vmem>>, vector<1x8xf32>,
    %c0_5 = arith.constant 0 : index
    %c0_6 = arith.constant 0 : index
    %c0_7 = arith.constant 0 : index
    %4 = vector.load %arg1[%c0_5, %c0_6, %c0_7] : memref<2x16x4xbf16, #tpu.memory_space<vmem>>, vector<1x16x4xbf16>
    %5 = vector.shape_cast %4 : vector<1x16x4xbf16> to vector<16x4xbf16>
    %6 = arith.extf %5 : vector<16x4xbf16> to vector<16x4xf32>
    %c1 = arith.constant 1 : index
    %c0_8 = arith.constant 0 : index
    %7 = vector.load %arg6[%c1, %c0_8] : memref<18x4xf32, #tpu.memory_space<vmem>>, vector<16x4xf32>
    tpu.vector_store %arg6[%c1, %c0_8], %6 {strides = array<i32>} : memref<18x4xf32, #tpu.memory_space<vmem>>, vector<16x4xf32>,
    %8 = vector.extract_strided_slice %6 {offsets = [0, 0], sizes = [1, 4], strides = [1, 1]} : vector<16x4xf32> to vector<1x4xf32>
    %c0_9 = arith.constant 0 : index
    %c0_10 = arith.constant 0 : index
    %9 = vector.load %arg6[%c0_9, %c0_10] : memref<18x4xf32, #tpu.memory_space<vmem>>, vector<1x4xf32>
    tpu.vector_store %arg6[%c0_9, %c0_10], %8 {strides = array<i32>} : memref<18x4xf32, #tpu.memory_space<vmem>>, vector<1x4xf32>,
    %10 = vector.extract_strided_slice %6 {offsets = [15, 0], sizes = [1, 4], strides = [1, 1]} : vector<16x4xf32> to vector<1x4xf32>
    %c17 = arith.constant 17 : index
    %c0_11 = arith.constant 0 : index
    %11 = vector.load %arg6[%c17, %c0_11] : memref<18x4xf32, #tpu.memory_space<vmem>>, vector<1x4xf32>
    tpu.vector_store %arg6[%c17, %c0_11], %10 {strides = array<i32>} : memref<18x4xf32, #tpu.memory_space<vmem>>, vector<1x4xf32>,
    %c0_12 = arith.constant 0 : index
    %c0_13 = arith.constant 0 : index
    %12 = vector.load %arg6[%c0_12, %c0_13] : memref<18x4xf32, #tpu.memory_space<vmem>>, vector<16x4xf32>
    %c0_14 = arith.constant 0 : index
    %c0_15 = arith.constant 0 : index
    %c0_16 = arith.constant 0 : index
    %13 = vector.load %arg2[%c0_14, %c0_15, %c0_16] : memref<3x4x8xf32, #tpu.memory_space<vmem>>, vector<1x4x8xf32>
    %14 = vector.shape_cast %13 : vector<1x4x8xf32> to vector<4x8xf32>
    %cst_17 = arith.constant dense<0.000000e+00> : vector<16x8xf32>
    %15 = tpu.matmul %12, %14, %cst_17 {dimension_numbers = #tpu.dot_dimension_numbers<[1], [0], [0], [1], [0, 0, 1, 1], [], []>} : vector<16x4xf32>, vector<4x8xf32>, vector<16x8xf32> -> vector<16x8xf32>
    %c1_18 = arith.constant 1 : index
    %c0_19 = arith.constant 0 : index
    %16 = vector.load %arg6[%c1_18, %c0_19] : memref<18x4xf32, #tpu.memory_space<vmem>>, vector<16x4xf32>
    %c1_20 = arith.constant 1 : index
    %c0_21 = arith.constant 0 : index
    %c0_22 = arith.constant 0 : index
    %17 = vector.load %arg2[%c1_20, %c0_21, %c0_22] : memref<3x4x8xf32, #tpu.memory_space<vmem>>, vector<1x4x8xf32>
    %18 = vector.shape_cast %17 : vector<1x4x8xf32> to vector<4x8xf32>
    %cst_23 = arith.constant dense<0.000000e+00> : vector<16x8xf32>
    %19 = tpu.matmul %16, %18, %cst_23 {dimension_numbers = #tpu.dot_dimension_numbers<[1], [0], [0], [1], [0, 0, 1, 1], [], []>} : vector<16x4xf32>, vector<4x8xf32>, vector<16x8xf32> -> vector<16x8xf32>
    %20 = arith.addf %15, %19 : vector<16x8xf32>
    %c2 = arith.constant 2 : index
    %c0_24 = arith.constant 0 : index
    %21 = vector.load %arg6[%c2, %c0_24] : memref<18x4xf32, #tpu.memory_space<vmem>>, vector<16x4xf32>
    %c2_25 = arith.constant 2 : index
    %c0_26 = arith.constant 0 : index
    %c0_27 = arith.constant 0 : index
    %22 = vector.load %arg2[%c2_25, %c0_26, %c0_27] : memref<3x4x8xf32, #tpu.memory_space<vmem>>, vector<1x4x8xf32>
    %23 = vector.shape_cast %22 : vector<1x4x8xf32> to vector<4x8xf32>
    %cst_28 = arith.constant dense<0.000000e+00> : vector<16x8xf32>
    %24 = tpu.matmul %21, %23, %cst_28 {dimension_numbers = #tpu.dot_dimension_numbers<[1], [0], [0], [1], [0, 0, 1, 1], [], []>} : vector<16x4xf32>, vector<4x8xf32>, vector<16x8xf32> -> vector<16x8xf32>
    %25 = arith.addf %20, %24 : vector<16x8xf32>
    %26 = vector.broadcast %0 : vector<1x8xf32> to vector<16x8xf32>
    %27 = arith.mulf %25, %26 : vector<16x8xf32>
    %28 = vector.broadcast %1 : vector<1x8xf32> to vector<16x8xf32>
    %29 = arith.addf %27, %28 : vector<16x8xf32>
    %cst_29 = arith.constant 0.000000e+00 : f32
    %30 = vector.broadcast %cst_29 : f32 to vector<16x8xf32>
    %31 = arith.maximumf %29, %30 : vector<16x8xf32>
    %c1_30 = arith.constant 1 : index
    %c0_31 = arith.constant 0 : index
    %32 = vector.load %arg7[%c1_30, %c0_31] : memref<17x8xf32, #tpu.memory_space<vmem>>, vector<16x8xf32>
    tpu.vector_store %arg7[%c1_30, %c0_31], %31 {strides = array<i32>} : memref<17x8xf32, #tpu.memory_space<vmem>>, vector<16x8xf32>,
    %c0_32 = arith.constant 0 : index
    %c0_33 = arith.constant 0 : index
    %33 = tpu.strided_load %arg7[%c0_32, %c0_33] {strides = array<i32: 2, 1>} : memref<17x8xf32, #tpu.memory_space<vmem>>, vector<8x8xf32>
    %c1_34 = arith.constant 1 : index
    %c0_35 = arith.constant 0 : index
    %34 = tpu.strided_load %arg7[%c1_34, %c0_35] {strides = array<i32: 2, 1>} : memref<17x8xf32, #tpu.memory_space<vmem>>, vector<8x8xf32>
    %c2_36 = arith.constant 2 : index
    %c0_37 = arith.constant 0 : index
    %35 = tpu.strided_load %arg7[%c2_36, %c0_37] {strides = array<i32: 2, 1>} : memref<17x8xf32, #tpu.memory_space<vmem>>, vector<8x8xf32>
    %36 = arith.maximumf %34, %35 : vector<8x8xf32>
    %37 = arith.maximumf %36, %33 : vector<8x8xf32>
    %c0_38 = arith.constant 0 : index
    %c0_39 = arith.constant 0 : index
    %c0_40 = arith.constant 0 : index
    %38 = vector.load %arg5[%c0_38, %c0_39, %c0_40] : memref<2x8x8xf32, #tpu.memory_space<vmem>>, vector<1x8x8xf32>
    %39 = vector.shape_cast %38 : vector<1x8x8xf32> to vector<8x8xf32>
    %40 = vector.shape_cast %37 : vector<8x8xf32> to vector<1x8x8xf32>
    tpu.vector_store %arg5[%c0_38, %c0_39, %c0_40], %40 {strides = array<i32>} : memref<2x8x8xf32, #tpu.memory_space<vmem>>, vector<1x8x8xf32>,
    %c1_41 = arith.constant 1 : index
    %c0_42 = arith.constant 0 : index
    %c0_43 = arith.constant 0 : index
    %41 = vector.load %arg1[%c1_41, %c0_42, %c0_43] : memref<2x16x4xbf16, #tpu.memory_space<vmem>>, vector<1x16x4xbf16>
    %42 = vector.shape_cast %41 : vector<1x16x4xbf16> to vector<16x4xbf16>
    %43 = arith.extf %42 : vector<16x4xbf16> to vector<16x4xf32>
    %c1_44 = arith.constant 1 : index
    %c0_45 = arith.constant 0 : index
    %44 = vector.load %arg6[%c1_44, %c0_45] : memref<18x4xf32, #tpu.memory_space<vmem>>, vector<16x4xf32>
    tpu.vector_store %arg6[%c1_44, %c0_45], %43 {strides = array<i32>} : memref<18x4xf32, #tpu.memory_space<vmem>>, vector<16x4xf32>,
    %45 = vector.extract_strided_slice %43 {offsets = [0, 0], sizes = [1, 4], strides = [1, 1]} : vector<16x4xf32> to vector<1x4xf32>
    %c0_46 = arith.constant 0 : index
    %c0_47 = arith.constant 0 : index
    %46 = vector.load %arg6[%c0_46, %c0_47] : memref<18x4xf32, #tpu.memory_space<vmem>>, vector<1x4xf32>
    tpu.vector_store %arg6[%c0_46, %c0_47], %45 {strides = array<i32>} : memref<18x4xf32, #tpu.memory_space<vmem>>, vector<1x4xf32>,
    %47 = vector.extract_strided_slice %43 {offsets = [15, 0], sizes = [1, 4], strides = [1, 1]} : vector<16x4xf32> to vector<1x4xf32>
    %c17_48 = arith.constant 17 : index
    %c0_49 = arith.constant 0 : index
    %48 = vector.load %arg6[%c17_48, %c0_49] : memref<18x4xf32, #tpu.memory_space<vmem>>, vector<1x4xf32>
    tpu.vector_store %arg6[%c17_48, %c0_49], %47 {strides = array<i32>} : memref<18x4xf32, #tpu.memory_space<vmem>>, vector<1x4xf32>,
    %c0_50 = arith.constant 0 : index
    %c0_51 = arith.constant 0 : index
    %49 = vector.load %arg6[%c0_50, %c0_51] : memref<18x4xf32, #tpu.memory_space<vmem>>, vector<16x4xf32>
    %c0_52 = arith.constant 0 : index
    %c0_53 = arith.constant 0 : index
    %c0_54 = arith.constant 0 : index
    %50 = vector.load %arg2[%c0_52, %c0_53, %c0_54] : memref<3x4x8xf32, #tpu.memory_space<vmem>>, vector<1x4x8xf32>
    %51 = vector.shape_cast %50 : vector<1x4x8xf32> to vector<4x8xf32>
    %cst_55 = arith.constant dense<0.000000e+00> : vector<16x8xf32>
    %52 = tpu.matmul %49, %51, %cst_55 {dimension_numbers = #tpu.dot_dimension_numbers<[1], [0], [0], [1], [0, 0, 1, 1], [], []>} : vector<16x4xf32>, vector<4x8xf32>, vector<16x8xf32> -> vector<16x8xf32>
    %c1_56 = arith.constant 1 : index
    %c0_57 = arith.constant 0 : index
    %53 = vector.load %arg6[%c1_56, %c0_57] : memref<18x4xf32, #tpu.memory_space<vmem>>, vector<16x4xf32>
    %c1_58 = arith.constant 1 : index
    %c0_59 = arith.constant 0 : index
    %c0_60 = arith.constant 0 : index
    %54 = vector.load %arg2[%c1_58, %c0_59, %c0_60] : memref<3x4x8xf32, #tpu.memory_space<vmem>>, vector<1x4x8xf32>
    %55 = vector.shape_cast %54 : vector<1x4x8xf32> to vector<4x8xf32>
    %cst_61 = arith.constant dense<0.000000e+00> : vector<16x8xf32>
    %56 = tpu.matmul %53, %55, %cst_61 {dimension_numbers = #tpu.dot_dimension_numbers<[1], [0], [0], [1], [0, 0, 1, 1], [], []>} : vector<16x4xf32>, vector<4x8xf32>, vector<16x8xf32> -> vector<16x8xf32>
    %57 = arith.addf %52, %56 : vector<16x8xf32>
    %c2_62 = arith.constant 2 : index
    %c0_63 = arith.constant 0 : index
    %58 = vector.load %arg6[%c2_62, %c0_63] : memref<18x4xf32, #tpu.memory_space<vmem>>, vector<16x4xf32>
    %c2_64 = arith.constant 2 : index
    %c0_65 = arith.constant 0 : index
    %c0_66 = arith.constant 0 : index
    %59 = vector.load %arg2[%c2_64, %c0_65, %c0_66] : memref<3x4x8xf32, #tpu.memory_space<vmem>>, vector<1x4x8xf32>
    %60 = vector.shape_cast %59 : vector<1x4x8xf32> to vector<4x8xf32>
    %cst_67 = arith.constant dense<0.000000e+00> : vector<16x8xf32>
    %61 = tpu.matmul %58, %60, %cst_67 {dimension_numbers = #tpu.dot_dimension_numbers<[1], [0], [0], [1], [0, 0, 1, 1], [], []>} : vector<16x4xf32>, vector<4x8xf32>, vector<16x8xf32> -> vector<16x8xf32>
    %62 = arith.addf %57, %61 : vector<16x8xf32>
    %63 = vector.broadcast %0 : vector<1x8xf32> to vector<16x8xf32>
    %64 = arith.mulf %62, %63 : vector<16x8xf32>
    %65 = vector.broadcast %1 : vector<1x8xf32> to vector<16x8xf32>
    %66 = arith.addf %64, %65 : vector<16x8xf32>
    %cst_68 = arith.constant 0.000000e+00 : f32
    %67 = vector.broadcast %cst_68 : f32 to vector<16x8xf32>
    %68 = arith.maximumf %66, %67 : vector<16x8xf32>
    %c1_69 = arith.constant 1 : index
    %c0_70 = arith.constant 0 : index
    %69 = vector.load %arg7[%c1_69, %c0_70] : memref<17x8xf32, #tpu.memory_space<vmem>>, vector<16x8xf32>
    tpu.vector_store %arg7[%c1_69, %c0_70], %68 {strides = array<i32>} : memref<17x8xf32, #tpu.memory_space<vmem>>, vector<16x8xf32>,
    %c0_71 = arith.constant 0 : index
    %c0_72 = arith.constant 0 : index
    %70 = tpu.strided_load %arg7[%c0_71, %c0_72] {strides = array<i32: 2, 1>} : memref<17x8xf32, #tpu.memory_space<vmem>>, vector<8x8xf32>
    %c1_73 = arith.constant 1 : index
    %c0_74 = arith.constant 0 : index
    %71 = tpu.strided_load %arg7[%c1_73, %c0_74] {strides = array<i32: 2, 1>} : memref<17x8xf32, #tpu.memory_space<vmem>>, vector<8x8xf32>
    %c2_75 = arith.constant 2 : index
    %c0_76 = arith.constant 0 : index
    %72 = tpu.strided_load %arg7[%c2_75, %c0_76] {strides = array<i32: 2, 1>} : memref<17x8xf32, #tpu.memory_space<vmem>>, vector<8x8xf32>
    %73 = arith.maximumf %71, %72 : vector<8x8xf32>
    %74 = arith.maximumf %73, %70 : vector<8x8xf32>
    %c1_77 = arith.constant 1 : index
    %c0_78 = arith.constant 0 : index
    %c0_79 = arith.constant 0 : index
    %75 = vector.load %arg5[%c1_77, %c0_78, %c0_79] : memref<2x8x8xf32, #tpu.memory_space<vmem>>, vector<1x8x8xf32>
    %76 = vector.shape_cast %75 : vector<1x8x8xf32> to vector<8x8xf32>
    %77 = vector.shape_cast %74 : vector<8x8xf32> to vector<1x8x8xf32>
    tpu.vector_store %arg5[%c1_77, %c0_78, %c0_79], %77 {strides = array<i32>} : memref<2x8x8xf32, #tpu.memory_space<vmem>>, vector<1x8x8xf32>,
    return
  }
  func.func @transform_0(%arg0: i32) -> (i32, i32, i32) {
    %c0_i32 = arith.constant 0 : i32
    %c0_i32_0 = arith.constant 0 : i32
    %c0_i32_1 = arith.constant 0 : i32
    return %arg0, %c0_i32, %c0_i32_0 : i32, i32, i32
  }
  func.func @transform_1(%arg0: i32) -> (i32, i32, i32) {
    %c0_i32 = arith.constant 0 : i32
    %c0_i32_0 = arith.constant 0 : i32
    %c0_i32_1 = arith.constant 0 : i32
    %c0_i32_2 = arith.constant 0 : i32
    return %c0_i32, %c0_i32_0, %c0_i32_1 : i32, i32, i32
  }
  func.func @transform_2(%arg0: i32) -> (i32, i32) {
    %c0_i32 = arith.constant 0 : i32
    %c0_i32_0 = arith.constant 0 : i32
    %c0_i32_1 = arith.constant 0 : i32
    return %c0_i32, %c0_i32_0 : i32, i32
  }
  func.func @transform_3(%arg0: i32) -> (i32, i32) {
    %c0_i32 = arith.constant 0 : i32
    %c0_i32_0 = arith.constant 0 : i32
    %c0_i32_1 = arith.constant 0 : i32
    return %c0_i32, %c0_i32_0 : i32, i32
  }
  func.func @transform_4(%arg0: i32) -> (i32, i32, i32) {
    %c0_i32 = arith.constant 0 : i32
    %c0_i32_0 = arith.constant 0 : i32
    %c0_i32_1 = arith.constant 0 : i32
    return %arg0, %c0_i32, %c0_i32_0 : i32, i32, i32
  }
}

module attributes {stable_mosaic.version = 11 : i64} {
  func.func @stats_kernel(%arg0: i32, %arg1: i32, %arg2: memref<2x16x4xbf16, #tpu.memory_space<vmem>>, %arg3: memref<3x4x8xf32, #tpu.memory_space<vmem>>, %arg4: memref<1x2x8xf32, #tpu.memory_space<vmem>>, %arg5: memref<18x4xf32, #tpu.memory_space<vmem>>) attributes {dimension_semantics = [#tpu.dimension_semantics<parallel>, #tpu.dimension_semantics<arbitrary>], iteration_bounds = array<i64: 1, 1>, scalar_prefetch = 0 : i64, scratch_operands = 1 : i64, tpu.core_type = #tpu.core_type<tc>, window_params = [{transform_indices = @transform_0, window_bounds = array<i64: 2, 16, 4>}, {pipeline_mode = #tpu.pipeline_mode<synchronous>, transform_indices = @transform_1, window_bounds = array<i64: 3, 4, 8>}, {transform_indices = @transform_2, window_bounds = array<i64: 1, 2, 8>}]} {
    %c0_i32 = arith.constant 0 : i32
    %0 = arith.cmpi eq, %arg1, %c0_i32 : i32
    %1 = arith.extui %0 : i1 to i32
    %c0_i32_0 = arith.constant 0 : i32
    %2 = arith.cmpi ne, %1, %c0_i32_0 : i32
    scf.if %2 {
      %cst_68 = arith.constant 0.000000e+00 : f32
      %75 = vector.broadcast %cst_68 : f32 to vector<2x8xf32>
      %c0_69 = arith.constant 0 : index
      %c0_70 = arith.constant 0 : index
      %c0_71 = arith.constant 0 : index
      %76 = vector.load %arg4[%c0_69, %c0_70, %c0_71] : memref<1x2x8xf32, #tpu.memory_space<vmem>>, vector<1x2x8xf32>
      %77 = vector.shape_cast %76 : vector<1x2x8xf32> to vector<2x8xf32>
      %78 = vector.shape_cast %75 : vector<2x8xf32> to vector<1x2x8xf32>
      tpu.vector_store %arg4[%c0_69, %c0_70, %c0_71], %78 {strides = array<i32>} : memref<1x2x8xf32, #tpu.memory_space<vmem>>, vector<1x2x8xf32>,
    } else {
    }
    %cst = arith.constant 0.000000e+00 : f32
    %3 = vector.broadcast %cst : f32 to vector<1x8xf32>
    %cst_1 = arith.constant 0.000000e+00 : f32
    %4 = vector.broadcast %cst_1 : f32 to vector<1x8xf32>
    %c0 = arith.constant 0 : index
    %c0_2 = arith.constant 0 : index
    %c0_3 = arith.constant 0 : index
    %5 = vector.load %arg2[%c0, %c0_2, %c0_3] : memref<2x16x4xbf16, #tpu.memory_space<vmem>>, vector<1x16x4xbf16>
    %6 = vector.shape_cast %5 : vector<1x16x4xbf16> to vector<16x4xbf16>
    %7 = arith.extf %6 : vector<16x4xbf16> to vector<16x4xf32>
    %c1 = arith.constant 1 : index
    %c0_4 = arith.constant 0 : index
    %8 = vector.load %arg5[%c1, %c0_4] : memref<18x4xf32, #tpu.memory_space<vmem>>, vector<16x4xf32>
    tpu.vector_store %arg5[%c1, %c0_4], %7 {strides = array<i32>} : memref<18x4xf32, #tpu.memory_space<vmem>>, vector<16x4xf32>,
    %9 = vector.extract_strided_slice %7 {offsets = [0, 0], sizes = [1, 4], strides = [1, 1]} : vector<16x4xf32> to vector<1x4xf32>
    %c0_5 = arith.constant 0 : index
    %c0_6 = arith.constant 0 : index
    %10 = vector.load %arg5[%c0_5, %c0_6] : memref<18x4xf32, #tpu.memory_space<vmem>>, vector<1x4xf32>
    tpu.vector_store %arg5[%c0_5, %c0_6], %9 {strides = array<i32>} : memref<18x4xf32, #tpu.memory_space<vmem>>, vector<1x4xf32>,
    %11 = vector.extract_strided_slice %7 {offsets = [15, 0], sizes = [1, 4], strides = [1, 1]} : vector<16x4xf32> to vector<1x4xf32>
    %c17 = arith.constant 17 : index
    %c0_7 = arith.constant 0 : index
    %12 = vector.load %arg5[%c17, %c0_7] : memref<18x4xf32, #tpu.memory_space<vmem>>, vector<1x4xf32>
    tpu.vector_store %arg5[%c17, %c0_7], %11 {strides = array<i32>} : memref<18x4xf32, #tpu.memory_space<vmem>>, vector<1x4xf32>,
    %c0_8 = arith.constant 0 : index
    %c0_9 = arith.constant 0 : index
    %13 = vector.load %arg5[%c0_8, %c0_9] : memref<18x4xf32, #tpu.memory_space<vmem>>, vector<16x4xf32>
    %c0_10 = arith.constant 0 : index
    %c0_11 = arith.constant 0 : index
    %c0_12 = arith.constant 0 : index
    %14 = vector.load %arg3[%c0_10, %c0_11, %c0_12] : memref<3x4x8xf32, #tpu.memory_space<vmem>>, vector<1x4x8xf32>
    %15 = vector.shape_cast %14 : vector<1x4x8xf32> to vector<4x8xf32>
    %cst_13 = arith.constant dense<0.000000e+00> : vector<16x8xf32>
    %16 = tpu.matmul %13, %15, %cst_13 {dimension_numbers = #tpu.dot_dimension_numbers<[1], [0], [0], [1], [0, 0, 1, 1], [], []>} : vector<16x4xf32>, vector<4x8xf32>, vector<16x8xf32> -> vector<16x8xf32>
    %c1_14 = arith.constant 1 : index
    %c0_15 = arith.constant 0 : index
    %17 = vector.load %arg5[%c1_14, %c0_15] : memref<18x4xf32, #tpu.memory_space<vmem>>, vector<16x4xf32>
    %c1_16 = arith.constant 1 : index
    %c0_17 = arith.constant 0 : index
    %c0_18 = arith.constant 0 : index
    %18 = vector.load %arg3[%c1_16, %c0_17, %c0_18] : memref<3x4x8xf32, #tpu.memory_space<vmem>>, vector<1x4x8xf32>
    %19 = vector.shape_cast %18 : vector<1x4x8xf32> to vector<4x8xf32>
    %cst_19 = arith.constant dense<0.000000e+00> : vector<16x8xf32>
    %20 = tpu.matmul %17, %19, %cst_19 {dimension_numbers = #tpu.dot_dimension_numbers<[1], [0], [0], [1], [0, 0, 1, 1], [], []>} : vector<16x4xf32>, vector<4x8xf32>, vector<16x8xf32> -> vector<16x8xf32>
    %21 = arith.addf %16, %20 : vector<16x8xf32>
    %c2 = arith.constant 2 : index
    %c0_20 = arith.constant 0 : index
    %22 = vector.load %arg5[%c2, %c0_20] : memref<18x4xf32, #tpu.memory_space<vmem>>, vector<16x4xf32>
    %c2_21 = arith.constant 2 : index
    %c0_22 = arith.constant 0 : index
    %c0_23 = arith.constant 0 : index
    %23 = vector.load %arg3[%c2_21, %c0_22, %c0_23] : memref<3x4x8xf32, #tpu.memory_space<vmem>>, vector<1x4x8xf32>
    %24 = vector.shape_cast %23 : vector<1x4x8xf32> to vector<4x8xf32>
    %cst_24 = arith.constant dense<0.000000e+00> : vector<16x8xf32>
    %25 = tpu.matmul %22, %24, %cst_24 {dimension_numbers = #tpu.dot_dimension_numbers<[1], [0], [0], [1], [0, 0, 1, 1], [], []>} : vector<16x4xf32>, vector<4x8xf32>, vector<16x8xf32> -> vector<16x8xf32>
    %26 = arith.addf %21, %25 : vector<16x8xf32>
    %cst_25 = arith.constant dense<0.000000e+00> : vector<8xf32>
    %27 = vector.multi_reduction <add>, %26, %cst_25 [0] : vector<16x8xf32> to vector<8xf32>
    %28 = vector.shape_cast %27 : vector<8xf32> to vector<1x8xf32>
    %29 = arith.addf %3, %28 : vector<1x8xf32>
    %30 = arith.mulf %26, %26 : vector<16x8xf32>
    %cst_26 = arith.constant dense<0.000000e+00> : vector<8xf32>
    %31 = vector.multi_reduction <add>, %30, %cst_26 [0] : vector<16x8xf32> to vector<8xf32>
    %32 = vector.shape_cast %31 : vector<8xf32> to vector<1x8xf32>
    %33 = arith.addf %4, %32 : vector<1x8xf32>
    %c1_27 = arith.constant 1 : index
    %c0_28 = arith.constant 0 : index
    %c0_29 = arith.constant 0 : index
    %34 = vector.load %arg2[%c1_27, %c0_28, %c0_29] : memref<2x16x4xbf16, #tpu.memory_space<vmem>>, vector<1x16x4xbf16>
    %35 = vector.shape_cast %34 : vector<1x16x4xbf16> to vector<16x4xbf16>
    %36 = arith.extf %35 : vector<16x4xbf16> to vector<16x4xf32>
    %c1_30 = arith.constant 1 : index
    %c0_31 = arith.constant 0 : index
    %37 = vector.load %arg5[%c1_30, %c0_31] : memref<18x4xf32, #tpu.memory_space<vmem>>, vector<16x4xf32>
    tpu.vector_store %arg5[%c1_30, %c0_31], %36 {strides = array<i32>} : memref<18x4xf32, #tpu.memory_space<vmem>>, vector<16x4xf32>,
    %38 = vector.extract_strided_slice %36 {offsets = [0, 0], sizes = [1, 4], strides = [1, 1]} : vector<16x4xf32> to vector<1x4xf32>
    %c0_32 = arith.constant 0 : index
    %c0_33 = arith.constant 0 : index
    %39 = vector.load %arg5[%c0_32, %c0_33] : memref<18x4xf32, #tpu.memory_space<vmem>>, vector<1x4xf32>
    tpu.vector_store %arg5[%c0_32, %c0_33], %38 {strides = array<i32>} : memref<18x4xf32, #tpu.memory_space<vmem>>, vector<1x4xf32>,
    %40 = vector.extract_strided_slice %36 {offsets = [15, 0], sizes = [1, 4], strides = [1, 1]} : vector<16x4xf32> to vector<1x4xf32>
    %c17_34 = arith.constant 17 : index
    %c0_35 = arith.constant 0 : index
    %41 = vector.load %arg5[%c17_34, %c0_35] : memref<18x4xf32, #tpu.memory_space<vmem>>, vector<1x4xf32>
    tpu.vector_store %arg5[%c17_34, %c0_35], %40 {strides = array<i32>} : memref<18x4xf32, #tpu.memory_space<vmem>>, vector<1x4xf32>,
    %c0_36 = arith.constant 0 : index
    %c0_37 = arith.constant 0 : index
    %42 = vector.load %arg5[%c0_36, %c0_37] : memref<18x4xf32, #tpu.memory_space<vmem>>, vector<16x4xf32>
    %c0_38 = arith.constant 0 : index
    %c0_39 = arith.constant 0 : index
    %c0_40 = arith.constant 0 : index
    %43 = vector.load %arg3[%c0_38, %c0_39, %c0_40] : memref<3x4x8xf32, #tpu.memory_space<vmem>>, vector<1x4x8xf32>
    %44 = vector.shape_cast %43 : vector<1x4x8xf32> to vector<4x8xf32>
    %cst_41 = arith.constant dense<0.000000e+00> : vector<16x8xf32>
    %45 = tpu.matmul %42, %44, %cst_41 {dimension_numbers = #tpu.dot_dimension_numbers<[1], [0], [0], [1], [0, 0, 1, 1], [], []>} : vector<16x4xf32>, vector<4x8xf32>, vector<16x8xf32> -> vector<16x8xf32>
    %c1_42 = arith.constant 1 : index
    %c0_43 = arith.constant 0 : index
    %46 = vector.load %arg5[%c1_42, %c0_43] : memref<18x4xf32, #tpu.memory_space<vmem>>, vector<16x4xf32>
    %c1_44 = arith.constant 1 : index
    %c0_45 = arith.constant 0 : index
    %c0_46 = arith.constant 0 : index
    %47 = vector.load %arg3[%c1_44, %c0_45, %c0_46] : memref<3x4x8xf32, #tpu.memory_space<vmem>>, vector<1x4x8xf32>
    %48 = vector.shape_cast %47 : vector<1x4x8xf32> to vector<4x8xf32>
    %cst_47 = arith.constant dense<0.000000e+00> : vector<16x8xf32>
    %49 = tpu.matmul %46, %48, %cst_47 {dimension_numbers = #tpu.dot_dimension_numbers<[1], [0], [0], [1], [0, 0, 1, 1], [], []>} : vector<16x4xf32>, vector<4x8xf32>, vector<16x8xf32> -> vector<16x8xf32>
    %50 = arith.addf %45, %49 : vector<16x8xf32>
    %c2_48 = arith.constant 2 : index
    %c0_49 = arith.constant 0 : index
    %51 = vector.load %arg5[%c2_48, %c0_49] : memref<18x4xf32, #tpu.memory_space<vmem>>, vector<16x4xf32>
    %c2_50 = arith.constant 2 : index
    %c0_51 = arith.constant 0 : index
    %c0_52 = arith.constant 0 : index
    %52 = vector.load %arg3[%c2_50, %c0_51, %c0_52] : memref<3x4x8xf32, #tpu.memory_space<vmem>>, vector<1x4x8xf32>
    %53 = vector.shape_cast %52 : vector<1x4x8xf32> to vector<4x8xf32>
    %cst_53 = arith.constant dense<0.000000e+00> : vector<16x8xf32>
    %54 = tpu.matmul %51, %53, %cst_53 {dimension_numbers = #tpu.dot_dimension_numbers<[1], [0], [0], [1], [0, 0, 1, 1], [], []>} : vector<16x4xf32>, vector<4x8xf32>, vector<16x8xf32> -> vector<16x8xf32>
    %55 = arith.addf %50, %54 : vector<16x8xf32>
    %cst_54 = arith.constant dense<0.000000e+00> : vector<8xf32>
    %56 = vector.multi_reduction <add>, %55, %cst_54 [0] : vector<16x8xf32> to vector<8xf32>
    %57 = vector.shape_cast %56 : vector<8xf32> to vector<1x8xf32>
    %58 = arith.addf %29, %57 : vector<1x8xf32>
    %59 = arith.mulf %55, %55 : vector<16x8xf32>
    %cst_55 = arith.constant dense<0.000000e+00> : vector<8xf32>
    %60 = vector.multi_reduction <add>, %59, %cst_55 [0] : vector<16x8xf32> to vector<8xf32>
    %61 = vector.shape_cast %60 : vector<8xf32> to vector<1x8xf32>
    %62 = arith.addf %33, %61 : vector<1x8xf32>
    %c0_56 = arith.constant 0 : index
    %c0_57 = arith.constant 0 : index
    %c0_58 = arith.constant 0 : index
    %63 = vector.load %arg4[%c0_56, %c0_57, %c0_58] : memref<1x2x8xf32, #tpu.memory_space<vmem>>, vector<1x1x8xf32>
    %64 = vector.shape_cast %63 : vector<1x1x8xf32> to vector<1x8xf32>
    %65 = arith.addf %64, %58 : vector<1x8xf32>
    %c0_59 = arith.constant 0 : index
    %c0_60 = arith.constant 0 : index
    %c0_61 = arith.constant 0 : index
    %66 = vector.load %arg4[%c0_59, %c0_60, %c0_61] : memref<1x2x8xf32, #tpu.memory_space<vmem>>, vector<1x1x8xf32>
    %67 = vector.shape_cast %66 : vector<1x1x8xf32> to vector<1x8xf32>
    %68 = vector.shape_cast %65 : vector<1x8xf32> to vector<1x1x8xf32>
    tpu.vector_store %arg4[%c0_59, %c0_60, %c0_61], %68 {strides = array<i32>} : memref<1x2x8xf32, #tpu.memory_space<vmem>>, vector<1x1x8xf32>,
    %c0_62 = arith.constant 0 : index
    %c1_63 = arith.constant 1 : index
    %c0_64 = arith.constant 0 : index
    %69 = vector.load %arg4[%c0_62, %c1_63, %c0_64] : memref<1x2x8xf32, #tpu.memory_space<vmem>>, vector<1x1x8xf32>
    %70 = vector.shape_cast %69 : vector<1x1x8xf32> to vector<1x8xf32>
    %71 = arith.addf %70, %62 : vector<1x8xf32>
    %c0_65 = arith.constant 0 : index
    %c1_66 = arith.constant 1 : index
    %c0_67 = arith.constant 0 : index
    %72 = vector.load %arg4[%c0_65, %c1_66, %c0_67] : memref<1x2x8xf32, #tpu.memory_space<vmem>>, vector<1x1x8xf32>
    %73 = vector.shape_cast %72 : vector<1x1x8xf32> to vector<1x8xf32>
    %74 = vector.shape_cast %71 : vector<1x8xf32> to vector<1x1x8xf32>
    tpu.vector_store %arg4[%c0_65, %c1_66, %c0_67], %74 {strides = array<i32>} : memref<1x2x8xf32, #tpu.memory_space<vmem>>, vector<1x1x8xf32>,
    return
  }
  func.func @transform_0(%arg0: i32, %arg1: i32) -> (i32, i32, i32) {
    %c1_i32 = arith.constant 1 : i32
    %0 = arith.muli %arg0, %c1_i32 : i32
    %1 = arith.addi %0, %arg1 : i32
    %c0_i32 = arith.constant 0 : i32
    %c0_i32_0 = arith.constant 0 : i32
    %c0_i32_1 = arith.constant 0 : i32
    return %1, %c0_i32, %c0_i32_0 : i32, i32, i32
  }
  func.func @transform_1(%arg0: i32, %arg1: i32) -> (i32, i32, i32) {
    %c0_i32 = arith.constant 0 : i32
    %c0_i32_0 = arith.constant 0 : i32
    %c0_i32_1 = arith.constant 0 : i32
    %c0_i32_2 = arith.constant 0 : i32
    return %c0_i32, %c0_i32_0, %c0_i32_1 : i32, i32, i32
  }
  func.func @transform_2(%arg0: i32, %arg1: i32) -> (i32, i32, i32) {
    %c0_i32 = arith.constant 0 : i32
    %c0_i32_0 = arith.constant 0 : i32
    %c0_i32_1 = arith.constant 0 : i32
    return %arg0, %c0_i32, %c0_i32_0 : i32, i32, i32
  }
}

</mosaic_0001>

<bundles_post_ra>
// kernel: conv_layer_forward.3
= control target key start
LH: loop header
LB: loop body
LE: loop exit
PB: predicated region body
PF: predicated region fallthrough
CT: control target
= control target key end

     0   :  { %vm46_vm0 = vcmask 1043456   ;;  %vm26_vm1 = vcmask 31744   ;;  %vm31_vm2 = vcmask 31751   ;;  %vm29_vm3 = vcmask 24576   ;;  %s859_s0 = inlined_call_operand.vmem [shape: bf16[2,16,4], index: 0, kind: input, shape index: {}]   ;;  %s860_s1 = inlined_call_operand.vmem [shape: f32[3,4,8], index: 1, kind: input, shape index: {}]   ;;  %s861_s2 = inlined_call_operand.vmem [shape: f32[1,8], index: 2, kind: input, shape index: {}]   ;;  %s862_s3 = inlined_call_operand.vmem [shape: f32[1,8], index: 3, kind: input, shape index: {}]   ;;  %s863_s4 = inlined_call_operand.hbm [shape: f32[2,8,8], index: 4, kind: output, shape index: {}]  }
   0x1   :  { %v631_v0 = vld [vmem:[%s860_s1 + $0x4] sm:$0xf]  ;;  %v35_v3 = vld [vmem:[%s860_s1] sm:$0xf] }
   0x2   :  { %v658_v1 = vld [vmem:[%s859_s0] sm:$0xff]   ;;  %684 = vmatprep.subr.msk.mxu0 %vm46_vm0, %v631_v0 }
   0x3   :  { %v659_v2 = vunpack.c.l.bf16 %v658_v1  ;;  %v660_v4 = vunpack.c.h.bf16 %v658_v1  ;;  %v646_v5 = vld [vmem:[%s860_s1 + $0x4] sm:$0xf]  ;;  %685 = vmatpush3.msk.msra.mxu0 %vm46_vm0, %v631_v0  ;;  %v339_v6 = vld [vmem:[%s860_s1] sm:$0xf] }
   0x4   :  { %699 = vmatprep.subr.msk.mxu1 %vm46_vm0, %v646_v5  ;;  %689 = vmatprep.subr.msk.mxu0 %vm46_vm0, %v35_v3 }
   0x5   :  { %27 = vst.msk [vmem:[#allocation2 + $0x1] sm:$0xff] %vm26_vm1, %v659_v2  ;;  %28 = vst.msk [vmem:[#allocation2 + $0x9] sm:$0xff] %vm26_vm1, %v660_v4  ;;  %700 = vmatpush3.msk.msra.mxu1 %vm46_vm0, %v646_v5 }
   0x6   :  { %32 = vst.msk [vmem:[#allocation2 + $0xa] sm:$0x80] %vm31_vm2, %v660_v4 }
   0x7   :  { %30 = vst.msk [vmem:[#allocation2] sm:$0x1] %vm29_vm3, %v659_v2 }
   0x8   :  { %9 = vsyncpa [#allocation5], 0  ;;  %704 = vmatprep.subr.msk.mxu1 %vm46_vm0, %v339_v6  ;;  %v665_v7 = vld [vmem:[%s859_s0 + $0x8] sm:$0xff]   ;;  %vm20_vm4 = vcmask 57344   ;;  %v750_v24 = vmov 0.0   ;;  %vm317_vm5 = vcmask 64512  }
   0x9   :  { %v664_v8 = vunpack.c.h.bf16 %v665_v7  ;;  %v663_v9 = vunpack.c.l.bf16 %v665_v7  ;;  %v638_v10 = vld [vmem:[%s860_s1 + $0x8] sm:$0xf]  ;;  %21 = vst.msk [vmem:[#allocation3] sm:$0x1] %vm20_vm4, %v750_v24  ;;  %v642_v25 = vld [vmem:[%s861_s2] ss:$0 sm:$0xff] }
   0xa   :  { %v653_v20 = vld [vmem:[%s860_s1 + $0x8] sm:$0xf]  ;;  %v643_v26 = vld [vmem:[%s862_s3] ss:$0 sm:$0xff]  ;;  %s751_s2 = smov [#allocation4]  }
   0xb   :  { %s620_s3 = sshll.u32 %s751_s2, 4  ;;  %s621_s3 = int_to_ptr.vmem [resolvable:$true] %s620_s3 }
   0xc   :  { %v36_v11 = vld [vmem:[#allocation2 + $0x1] sm:$0xff]  ;;  %v37_v13 = vld [vmem:[#allocation2 + $0x9] sm:$0xff]  ;;  %s726_s7 = scalar_lea.vmem %s621_s3, 256  ;;  %p731_p1 = scmp.lt.s32.totalorder %s621_s3, %s621_s3 }
   0xd   :  { %v34_v12 = vld [vmem:[#allocation2 + $0x8] sm:$0xff]  ;;  %686 = vmatprep.mubr.msk.f32.mxu0 %vm26_vm1, %v36_v11  ;;  %p727_p0 = scmp.ne.s32.totalorder %s621_s3, %s726_s7  ;;  %p732_p2 = scmp.lt.s32.totalorder %s726_s7, %s726_s7 }
   0xe   :  { %v209_v14 = vld [vmem:[#allocation2 + $0x2] sm:$0xff]  ;;  %v210_v15 = vld [vmem:[#allocation2 + $0xa] sm:$0xff]  ;;  %687 = vmatmul.mubr.msk.f32.vlgmr.msra.gmra.mrb[0].mxu0 %vm26_vm1, %v37_v13 }
   0xf   :  { %v33_v16 = vld [vmem:[#allocation2] sm:$0xff]  ;;  %334 = vst.msk [vmem:[#allocation2 + $0x9] sm:$0xff] %vm26_vm1, %v664_v8  ;;  %690 = vmatpush3.msk.msra.mxu0 %vm46_vm0, %v35_v3  ;;  %p733_p3 = por %p732_p2, %p731_p1 }
  0x10   :  { %336 = vst.msk [vmem:[#allocation2 + $0xa] sm:$0x80] %vm31_vm2, %v664_v8  ;;  %691 = vmatprep.mubr.msk.f32.mxu0 %vm26_vm1, %v33_v16  ;;  %694 = vmatprep.subr.msk.mxu0 %vm46_vm0, %v638_v10 }
  0x11   :  { %333 = vst.msk [vmem:[#allocation2 + $0x1] sm:$0xff] %vm26_vm1, %v663_v9  ;;  %p734_p4 = pnand %p733_p3, %p727_p0 }
  0x12   :  { %335 = vst.msk [vmem:[#allocation2] sm:$0x1] %vm29_vm3, %v663_v9 }
  0x16   :  { %v341_v18 = vld [vmem:[#allocation2 + $0x9] sm:$0xff]  ;;  %692 = vmatmul.mubr.msk.f32.vlgmr.msra.gmra.mrb[0].mxu0 %vm26_vm1, %v34_v12 }
  0x17   :  { %695 = vmatpush3.msk.msra.mxu0 %vm46_vm0, %v638_v10  ;;  %696 = vmatprep.mubr.msk.f32.mxu0 %vm26_vm1, %v209_v14  ;;  %v512_v23 = vld [vmem:[#allocation2 + $0xa] sm:$0xff] }
  0x18   :  { %v340_v17 = vld [vmem:[#allocation2 + $0x1] sm:$0xff] }
  0x19   :  { %701 = vmatprep.mubr.msk.f32.mxu1 %vm26_vm1, %v340_v17  ;;  %v337_v19 = vld [vmem:[#allocation2] sm:$0xff]  ;;  %v338_v21 = vld [vmem:[#allocation2 + $0x8] sm:$0xff] }
  0x1a   :  { %702 = vmatmul.mubr.msk.f32.vlgmr.msra.gmra.mrb[0].mxu1 %vm26_vm1, %v341_v18  ;;  %v511_v22 = vld [vmem:[#allocation2 + $0x2] sm:$0xff] }
  0x1b   :  { %705 = vmatpush3.msk.msra.mxu1 %vm46_vm0, %v339_v6  ;;  %706 = vmatprep.mubr.msk.f32.mxu1 %vm26_vm1, %v337_v19 }
  0x1c   :  { %709 = vmatprep.subr.msk.mxu1 %vm46_vm0, %v653_v20 }
  0x1e   :  { %697 = vmatmul.mubr.msk.f32.vlgmr.msra.gmra.mrb[0].mxu0 %vm26_vm1, %v210_v15 }
  0x22   :  { %707 = vmatmul.mubr.msk.f32.vlgmr.msra.gmra.mrb[0].mxu1 %vm26_vm1, %v338_v21 }
  0x23   :  { %710 = vmatpush3.msk.msra.mxu1 %vm46_vm0, %v653_v20  ;;  %711 = vmatprep.mubr.msk.f32.mxu1 %vm26_vm1, %v511_v22 }
  0x2a   :  { %712 = vmatmul.mubr.msk.f32.vlgmr.msra.gmra.mrb[0].mxu1 %vm26_vm1, %v512_v23 }
  0xf1   :  { %v698_v27 = vpop.f32.mrb[0].mxu0 }
  0xf2   :  { %v306_v28 = vmul.f32 %v698_v27, %v642_v25  ;;  %v288_v29 = vpop.f32.mrb[1].mxu0 }
  0xf3   :  { %v305_v30 = vmul.f32 %v642_v25, %v288_v29 }
  0xf4   :  { %v314_v31 = vadd.f32 %v643_v26, %v306_v28 }
  0xf5   :  { %v313_v32 = vadd.f32 %v643_v26, %v305_v30 }
  0xf6   :  { %v316_v33 = vmax.f32 %v314_v31, 0.0 }
  0xf7   :  { %v315_v34 = vmax.f32 %v313_v32, 0.0 }
  0xf8   :  { %319 = vst.msk [vmem:[#allocation3 + $0x9] sm:$0xff] %vm317_vm5, %v316_v33 }
  0xf9   :  { %318 = vst.msk [vmem:[#allocation3 + $0x1] sm:$0xff] %vm317_vm5, %v315_v34 }
  0xfd   :  { %v713_v35 = vpop.f32.mrb[0].mxu1 }
  0xfe   :  { %v601_v36 = vmul.f32 %v713_v35, %v642_v25  ;;  %v589_v37 = vpop.f32.mrb[1].mxu1 }
  0xff   :  { %v600_v38 = vmul.f32 %v642_v25, %v589_v37 }
 0x100   :  { %v603_v39 = vadd.f32 %v643_v26, %v601_v36  ;;  %v320_v43 = vld [vmem:[#allocation3] ss:$2 sm:$0xff]  ;;  %v322_v44 = vld [vmem:[#allocation3 + $0x1] ss:$2 sm:$0xff] }
 0x101   :  { %v602_v40 = vadd.f32 %v643_v26, %v600_v38  ;;  %v324_v45 = vld [vmem:[#allocation3 + $0x2] ss:$2 sm:$0xff] }
 0x102   :  { %v605_v41 = vmax.f32 %v603_v39, 0.0  ;;  %v325_v46 = vmax.f32 %v322_v44, %v324_v45 }
 0x103   :  { %v604_v42 = vmax.f32 %v602_v40, 0.0 }
 0x104   :  { %607 = vst.msk [vmem:[#allocation3 + $0x9] sm:$0xff] %vm317_vm5, %v605_v41  ;;  %v326_v47 = vmax.f32 %v325_v46, %v320_v43 }
 0x105   :  { %606 = vst.msk [vmem:[#allocation3 + $0x1] sm:$0xff] %vm317_vm5, %v604_v42 }
 0x106   :  { %327 = vst.msk [vmem:[#allocation4] sm:$0xff] %vm317_vm5, %v326_v47 }
 0x10c   :  { %v609_v48 = vld [vmem:[#allocation3 + $0x1] ss:$2 sm:$0xff]  ;;  %v610_v49 = vld [vmem:[#allocation3 + $0x2] ss:$2 sm:$0xff] }
 0x10d   :  { %v611_v50 = vmax.f32 %v609_v48, %v610_v49  ;;  %v608_v51 = vld [vmem:[#allocation3] ss:$2 sm:$0xff] }
 0x10f   :  { %v612_v52 = vmax.f32 %v611_v50, %v608_v51 }
 0x111   :  { %614 = vst.msk [vmem:[#allocation4 + $0x8] sm:$0xff] %vm317_vm5, %v612_v52 }
 0x112   :  { %737 = shalt.err (!%p734_p4)
}
 0x113   :  { %s738_s10 = scalar_lea.hbm %s863_s4, 256 }
 0x114   :  { %p739_p5 = scmp.ne.s32.totalorder %s863_s4, %s738_s10  ;;  %p742_p6 = scmp.lt.u32.totalorder %s738_s10, %s863_s4 }
 0x116   :  { %p744_p7 = pnand %p742_p6, %p739_p5 }
 0x118   :  { %747 = shalt.err (!%p744_p7)
}
 0x119   :  { %s752_s15 = smov 128   ;;  %s753_s16 = smov 8  }
 0x11a   :  { %626 = dma.vmem_to_hbm [thread:$0]  %s621_s3, 256, %s863_s4, [#allocation5], %s752_s15, %s752_s15, %s753_s16  }
 0x11b   :  { %748 = dma.done.wait [#allocation5], 256  }
 0x11c   :  { %749 = vsyncadd [#allocation5], 4294967040 }
 0x11d   :  { %630 = vsyncpa [#allocation5], 1 }

// kernel: conv_layer_forward.2
= control target key start
LH: loop header
LB: loop body
LE: loop exit
PB: predicated region body
PF: predicated region fallthrough
CT: control target
= control target key end

     0   :  { %vm66_vm0 = vcmask 1043456   ;;  %vm46_vm1 = vcmask 31744   ;;  %vm51_vm2 = vcmask 31751   ;;  %vm49_vm3 = vcmask 24576   ;;  %s838_s1 = inlined_call_operand.vmem [shape: f32[3,4,8], index: 1, kind: input, shape index: {}]   ;;  %s839_s0 = inlined_call_operand.vmem [shape: bf16[2,16,4], index: 0, kind: input, shape index: {}]   ;;  %s840_s2 = inlined_call_operand.vmem [shape: f32[1,2,8], index: 2, kind: output, shape index: {}]  }
   0x1   :  { %v653_v0 = vld [vmem:[%s838_s1 + $0x4] sm:$0xf]  ;;  %v55_v5 = vld [vmem:[%s838_s1] sm:$0xf]  ;;  %v685_v7 = vld [vmem:[%s839_s0 + $0x8] sm:$0xff]   ;;  %vm40_vm4 = vcmask 58368  }
   0x2   :  { %v678_v1 = vld [vmem:[%s839_s0] sm:$0xff]   ;;  %704 = vmatprep.subr.msk.mxu0 %vm66_vm0, %v653_v0  ;;  %v684_v8 = vunpack.c.h.bf16 %v685_v7  ;;  %v683_v9 = vunpack.c.l.bf16 %v685_v7  ;;  %v660_v10 = vld [vmem:[%s838_s1 + $0x8] sm:$0xf]  ;;  %v743_v24 = vmov 0.0   ;;  %vm319_vm5 = vcmask 64512  }
   0x3   :  { %v679_v2 = vunpack.c.l.bf16 %v678_v1  ;;  %v680_v3 = vunpack.c.h.bf16 %v678_v1  ;;  %v666_v4 = vld [vmem:[%s838_s1 + $0x4] sm:$0xf]  ;;  %v353_v6 = vld [vmem:[%s838_s1] sm:$0xf]  ;;  %705 = vmatpush3.msk.msra.mxu0 %vm66_vm0, %v653_v0  ;;  %v673_v20 = vld [vmem:[%s838_s1 + $0x8] sm:$0xf] }
   0x4   :  { %719 = vmatprep.subr.msk.mxu1 %vm66_vm0, %v666_v4  ;;  %709 = vmatprep.subr.msk.mxu0 %vm66_vm0, %v55_v5  ;;  %41 = vst.msk [vmem:[%s840_s2] sm:$0x3] %vm40_vm4, %v743_v24  ;;  %vm638_vm6 = vcmask 57344  }
   0x5   :  { %47 = vst.msk [vmem:[#allocation2 + $0x1] sm:$0xff] %vm46_vm1, %v679_v2  ;;  %48 = vst.msk [vmem:[#allocation2 + $0x9] sm:$0xff] %vm46_vm1, %v680_v3  ;;  %720 = vmatpush3.msk.msra.mxu1 %vm66_vm0, %v666_v4 }
   0x6   :  { %52 = vst.msk [vmem:[#allocation2 + $0xa] sm:$0x80] %vm51_vm2, %v680_v3  ;;  %724 = vmatprep.subr.msk.mxu1 %vm66_vm0, %v353_v6 }
   0x7   :  { %50 = vst.msk [vmem:[#allocation2] sm:$0x1] %vm49_vm3, %v679_v2 }
   0xb   :  { %v636_v3 = vld [vmem:[%s840_s2] sm:$0x1]  ;;  %v640_v7 = vld [vmem:[%s840_s2 + $0x1] sm:$0x1] }
   0xc   :  { %v56_v11 = vld [vmem:[#allocation2 + $0x1] sm:$0xff]  ;;  %v57_v13 = vld [vmem:[#allocation2 + $0x9] sm:$0xff] }
   0xd   :  { %v54_v12 = vld [vmem:[#allocation2 + $0x8] sm:$0xff]  ;;  %706 = vmatprep.mubr.msk.f32.mxu0 %vm46_vm1, %v56_v11 }
   0xe   :  { %v229_v14 = vld [vmem:[#allocation2 + $0x2] sm:$0xff]  ;;  %v230_v15 = vld [vmem:[#allocation2 + $0xa] sm:$0xff]  ;;  %707 = vmatmul.mubr.msk.f32.vlgmr.msra.gmra.mrb[0].mxu0 %vm46_vm1, %v57_v13 }
   0xf   :  { %v53_v16 = vld [vmem:[#allocation2] sm:$0xff]  ;;  %348 = vst.msk [vmem:[#allocation2 + $0x9] sm:$0xff] %vm46_vm1, %v684_v8  ;;  %710 = vmatpush3.msk.msra.mxu0 %vm66_vm0, %v55_v5 }
  0x10   :  { %350 = vst.msk [vmem:[#allocation2 + $0xa] sm:$0x80] %vm51_vm2, %v684_v8  ;;  %711 = vmatprep.mubr.msk.f32.mxu0 %vm46_vm1, %v53_v16  ;;  %714 = vmatprep.subr.msk.mxu0 %vm66_vm0, %v660_v10 }
  0x11   :  { %347 = vst.msk [vmem:[#allocation2 + $0x1] sm:$0xff] %vm46_vm1, %v683_v9 }
  0x12   :  { %349 = vst.msk [vmem:[#allocation2] sm:$0x1] %vm49_vm3, %v683_v9 }
  0x16   :  { %v355_v18 = vld [vmem:[#allocation2 + $0x9] sm:$0xff]  ;;  %712 = vmatmul.mubr.msk.f32.vlgmr.msra.gmra.mrb[0].mxu0 %vm46_vm1, %v54_v12 }
  0x17   :  { %715 = vmatpush3.msk.msra.mxu0 %vm66_vm0, %v660_v10  ;;  %716 = vmatprep.mubr.msk.f32.mxu0 %vm46_vm1, %v229_v14  ;;  %v526_v23 = vld [vmem:[#allocation2 + $0xa] sm:$0xff] }
  0x18   :  { %v354_v17 = vld [vmem:[#allocation2 + $0x1] sm:$0xff] }
  0x19   :  { %721 = vmatprep.mubr.msk.f32.mxu1 %vm46_vm1, %v354_v17  ;;  %v351_v19 = vld [vmem:[#allocation2] sm:$0xff]  ;;  %v352_v21 = vld [vmem:[#allocation2 + $0x8] sm:$0xff] }
  0x1a   :  { %722 = vmatmul.mubr.msk.f32.vlgmr.msra.gmra.mrb[0].mxu1 %vm46_vm1, %v355_v18  ;;  %v525_v22 = vld [vmem:[#allocation2 + $0x2] sm:$0xff] }
  0x1b   :  { %725 = vmatpush3.msk.msra.mxu1 %vm66_vm0, %v353_v6  ;;  %726 = vmatprep.mubr.msk.f32.mxu1 %vm46_vm1, %v351_v19 }
  0x1c   :  { %729 = vmatprep.subr.msk.mxu1 %vm66_vm0, %v673_v20 }
  0x1e   :  { %717 = vmatmul.mubr.msk.f32.vlgmr.msra.gmra.mrb[0].mxu0 %vm46_vm1, %v230_v15 }
  0x22   :  { %727 = vmatmul.mubr.msk.f32.vlgmr.msra.gmra.mrb[0].mxu1 %vm46_vm1, %v352_v21 }
  0x23   :  { %730 = vmatpush3.msk.msra.mxu1 %vm66_vm0, %v673_v20  ;;  %731 = vmatprep.mubr.msk.f32.mxu1 %vm46_vm1, %v525_v22 }
  0x2a   :  { %732 = vmatmul.mubr.msk.f32.vlgmr.msra.gmra.mrb[0].mxu1 %vm46_vm1, %v526_v23 }
  0xf1   :  { %v718_v25 = vpop.f32.mrb[0].mxu0 }
  0xf2   :  { %v321_v26 = vsel %vm319_vm5, %v718_v25, 0.0  ;;  %v331_v27 = vmul.f32 %v718_v25, %v718_v25  ;;  %v308_v28 = vpop.f32.mrb[1].mxu0 }
  0xf3   :  { %v320_v29 = vsel %vm319_vm5, %v308_v28, 0.0  ;;  %v330_v30 = vmul.f32 %v308_v28, %v308_v28 }
  0xf4   :  { %v333_v31 = vsel %vm319_vm5, %v331_v27, 0.0  ;;  %v322_v32 = vadd.f32 %v321_v26, %v320_v29 }
  0xf5   :  { %v332_v33 = vsel %vm319_vm5, %v330_v30, 0.0 }
  0xf6   :  { %v323_v34 = vrot.slane %v322_v32, 4  ;;  %v334_v35 = vadd.f32 %v333_v31, %v332_v33 }
  0xf8   :  { %v335_v36 = vrot.slane %v334_v35, 4  ;;  %v324_v37 = vadd.f32 %v323_v34, %v322_v32 }
  0xfa   :  { %v336_v39 = vadd.f32 %v335_v36, %v334_v35  ;;  %v325_v45 = vrot.slane %v324_v37, 2 }
  0xfc   :  { %v337_v49 = vrot.slane %v336_v39, 2  ;;  %v326_v52 = vadd.f32 %v325_v45, %v324_v37 }
  0xfd   :  { %v733_v38 = vpop.f32.mrb[0].mxu1 }
  0xfe   :  { %v615_v40 = vsel %vm319_vm5, %v733_v38, 0.0  ;;  %v625_v41 = vmul.f32 %v733_v38, %v733_v38  ;;  %v603_v42 = vpop.f32.mrb[1].mxu1  ;;  %v338_v55 = vadd.f32 %v337_v49, %v336_v39  ;;  %v327_v58 = vrot.slane %v326_v52, 1 }
  0xff   :  { %v614_v43 = vsel %vm319_vm5, %v603_v42, 0.0  ;;  %v624_v44 = vmul.f32 %v603_v42, %v603_v42 }
 0x100   :  { %v627_v46 = vsel %vm319_vm5, %v625_v41, 0.0  ;;  %v616_v47 = vadd.f32 %v615_v40, %v614_v43  ;;  %v339_v61 = vrot.slane %v338_v55, 1  ;;  %v328_v0 = vadd.f32 %v327_v58, %v326_v52 }
 0x101   :  { %v626_v48 = vsel %vm319_vm5, %v624_v44, 0.0 }
 0x102   :  { %v617_v50 = vrot.slane %v616_v47, 4  ;;  %v628_v51 = vadd.f32 %v627_v46, %v626_v48  ;;  %v340_v4 = vadd.f32 %v339_v61, %v338_v55 }
 0x104   :  { %v618_v53 = vadd.f32 %v617_v50, %v616_v47  ;;  %v629_v54 = vrot.slane %v628_v51, 4 }
 0x106   :  { %v619_v56 = vrot.slane %v618_v53, 2  ;;  %v630_v57 = vadd.f32 %v629_v54, %v628_v51 }
 0x108   :  { %v620_v59 = vadd.f32 %v619_v56, %v618_v53  ;;  %v631_v60 = vrot.slane %v630_v57, 2 }
 0x10a   :  { %v621_v62 = vrot.slane %v620_v59, 1  ;;  %v632_v63 = vadd.f32 %v631_v60, %v630_v57 }
 0x10c   :  { %v622_v1 = vadd.f32 %v621_v62, %v620_v59  ;;  %v633_v2 = vrot.slane %v632_v63, 1 }
 0x10e   :  { %v623_v5 = vadd.f32 %v622_v1, %v328_v0  ;;  %v634_v6 = vadd.f32 %v633_v2, %v632_v63 }
 0x110   :  { %v635_v8 = vadd.f32 %v634_v6, %v340_v4  ;;  %v637_v9 = vadd.f32 %v636_v3, %v623_v5 }
 0x112   :  { %639 = vst.msk [vmem:[%s840_s2] sm:$0x1] %vm638_vm6, %v637_v9  ;;  %v641_v10 = vadd.f32 %v640_v7, %v635_v8 }
 0x114   :  { %642 = vst.msk [vmem:[%s840_s2 + $0x1] sm:$0x1] %vm638_vm6, %v641_v10 }

</bundles_post_ra>
